<compile_context>
chip_gen: v6e
topology: v6e:2x2x1
jax: 0.10.0
libtpu: 0.0.40
codegen_flags: <defaults>
</compile_context>

<pallas_src>
import math
import functools

import jax
import jax.numpy as jnp
from jax import lax
from jax.experimental import pallas as pl
from jax.experimental.pallas import tpu as pltpu


# ---------------------------------------------------------------------------
# Buffer construction (mirrors PositionalEncoding.__init__ exactly).
# ---------------------------------------------------------------------------
def make_positional_encoding(d_model: int, max_len: int = 5000,
                             dtype=jnp.float32) -> jax.Array:
    position = jnp.arange(max_len, dtype=jnp.float32)[:, None]          # [max_len, 1]
    div_term = jnp.exp(jnp.arange(0, d_model, 2, dtype=jnp.float32)
                       * (-math.log(10000.0) / d_model))                # [d_model/2]
    pe = jnp.zeros((max_len, 1, d_model), dtype=jnp.float32)
    pe = pe.at[:, 0, 0::2].set(jnp.sin(position * div_term))
    pe = pe.at[:, 0, 1::2].set(jnp.cos(position * div_term))
    return pe.astype(dtype)                                             # [max_len, 1, d_model]


# ---------------------------------------------------------------------------
# Kernels
# ---------------------------------------------------------------------------
def _pe_add_kernel(x_ref, pe_ref, o_ref):
    # x_ref / o_ref blocks: (R_TILE, LW) (batch dim squeezed), pe_ref: (R_TILE, LW)
    o_ref[...] = x_ref[...] + pe_ref[...].astype(x_ref.dtype)


def _hash_u32(x):
    # lowbias32-style integer finalizer: a few VPU int ops, good avalanche.
    x = x ^ (x >> 16)
    x = x * jnp.uint32(0x7FEB352D)
    x = x ^ (x >> 15)
    x = x * jnp.uint32(0x846CA68B)
    x = x ^ (x >> 16)
    return x


def _pe_add_dropout_kernel(seed_ref, x_ref, pe_ref, o_ref, *, p):
    # Training-mode inverted dropout.  NOTE: cannot bit-match torch's RNG stream.
    y = x_ref[...] + pe_ref[...].astype(x_ref.dtype)
    rows, lanes = o_ref.shape

    # Unique global element index: grid step (covers row-tile AND batch) +
    # (row, lane) within the block -> mask never repeats across tiles/batches.
    step = pl.program_id(1) * pl.num_programs(0) + pl.program_id(0)
    base = step * (rows * lanes)
    r_io = lax.broadcasted_iota(jnp.int32, (rows, lanes), 0)
    c_io = lax.broadcasted_iota(jnp.int32, (rows, lanes), 1)
    idx = (base + r_io * lanes + c_io).astype(jnp.uint32)

    seed_mix = _hash_u32(seed_ref[0].astype(jnp.uint32))
    bits = _hash_u32(idx * jnp.uint32(0x9E3779B9) + seed_mix)

    # Integer-threshold compare: keep iff bits >= p * 2^32 (no float uniform).
    thr = jnp.uint32(min(int(round(p * 4294967296.0)), 4294967295))
    keep = bits >= thr
    o_ref[...] = jnp.where(keep, y * (1.0 / (1.0 - p)), 0.0).astype(o_ref.dtype)


# ---------------------------------------------------------------------------
# Tiling choice
# ---------------------------------------------------------------------------
# ~1 MiB per block: with 3 operands x 2 pipeline buffers that is ~6 MiB of
# VMEM, comfortably inside every generation's default scoped limit, so no
# vmem_limit_bytes override is required.
_TARGET_BLOCK_BYTES = 1 << 20


def _choose_view(S, D, itemsize):
    """Pick lane width LW (multiple of 128 when possible) and row count NR so
    each batch element is viewed as [NR, LW]; then a row tile that is a
    multiple of 8 (or the full extent) sized ~_TARGET_BLOCK_BYTES."""
    if D % 128 == 0:
        lw = D
    elif (S * D) % 128 == 0:
        lw = 128
        while (S * D) % (lw * 2) == 0 and lw * 2 <= 2048:
            lw *= 2
    else:
        # TODO(synk): when S*D is not a multiple of 128 there is no clean
        # lane-dense view; falls back to D lanes (masked stores).
        lw = D
    nr = (S * D) // lw
    rows_cap = max(8, (_TARGET_BLOCK_BYTES // max(1, lw * itemsize)) // 8 * 8)
    r_tile = nr if nr <= rows_cap else rows_cap
    return lw, nr, r_tile


# ---------------------------------------------------------------------------
# Wrapper
# ---------------------------------------------------------------------------
def positional_encoding_forward(x: jax.Array, pe: jax.Array, *,
                                p: float = 0.1, training: bool = False,
                                seed: int = 0) -> jax.Array:
    """x: [B, S, D]; pe: [max_len, 1, D] (the module buffer).
    Returns dropout(x + pe[:S].transpose(0, 1)); dropout only when training."""
    B, S, D = x.shape
    max_len = pe.shape[0]
    itemsize = jnp.dtype(x.dtype).itemsize

    LW, NR, R_TILE = _choose_view(S, D, itemsize)
    grid_r = pl.cdiv(NR, R_TILE)

    xv = x.reshape(B, NR, LW)                         # free re-view, no copy

    # pe operand: pass the full buffer as a free reshaped view and let the
    # BlockSpec index_map do the "[:S]" selection (no per-call slice/cast HBM
    # round trip) whenever the (8,128) block rules allow it.
    if (max_len * D) % LW == 0 and R_TILE % 8 == 0:
        pe_src = pe.reshape((max_len * D) // LW, LW)
    else:
        pe_src = pe.reshape(max_len * D)[: S * D].reshape(NR, LW)

    # Grid: (row_tiles, batch); batch innermost so the pe block index is
    # constant across consecutive steps and its DMA is skipped.
    x_spec = pl.BlockSpec((None, R_TILE, LW), lambda ri, b, *_: (b, ri, 0))
    pe_spec = pl.BlockSpec((R_TILE, LW), lambda ri, b, *_: (ri, 0))
    out_spec = pl.BlockSpec((None, R_TILE, LW), lambda ri, b, *_: (b, ri, 0))
    out_shape = jax.ShapeDtypeStruct((B, NR, LW), x.dtype)
    cparams = pltpu.CompilerParams(
        dimension_semantics=("parallel", "parallel"))

    if (not training) or p <= 0.0:
        # Eval-mode dropout is the identity (matches nn.Dropout.eval()).
        out = pl.pallas_call(
            _pe_add_kernel,
            out_shape=out_shape,
            grid_spec=pltpu.PrefetchScalarGridSpec(
                num_scalar_prefetch=0,
                grid=(grid_r, B),
                in_specs=[x_spec, pe_spec],
                out_specs=out_spec),
            compiler_params=cparams,
        )(xv, pe_src)
    else:
        seed_arr = jnp.asarray([seed], dtype=jnp.int32)
        out = pl.pallas_call(
            functools.partial(_pe_add_dropout_kernel, p=float(p)),
            out_shape=out_shape,
            grid_spec=pltpu.PrefetchScalarGridSpec(
                num_scalar_prefetch=1,
                grid=(grid_r, B),
                in_specs=[x_spec, pe_spec],
                out_specs=out_spec),
            compiler_params=cparams,
        )(seed_arr, xv, pe_src)

    return out.reshape(B, S, D)


# ---------------------------------------------------------------------------
# Demo / self-check
# ---------------------------------------------------------------------------
if __name__ == "__main__":
    B, S, D = 2, 8, 32
    key = jax.random.PRNGKey(0)
    x = jax.random.normal(key, (B, S, D), dtype=jnp.float32)
    pe = make_positional_encoding(d_model=D, max_len=5000, dtype=jnp.float32)

    # ---- eval mode (dropout == identity, deterministic) ----
    out = jax.block_until_ready(
        positional_encoding_forward(x, pe, p=0.1, training=False))
    ref = x + jnp.transpose(pe[:S], (1, 0, 2))        # [1, S, D] broadcast over batch
    assert out.shape == (B, S, D)
    assert out.dtype == x.dtype
    assert jnp.allclose(out, ref, atol=1e-6, rtol=1e-6), "mismatch vs reference"

    # ---- training mode (dropout active) ----
    p_drop = 0.5
    out_tr = jax.block_until_ready(
        positional_encoding_forward(x, pe, p=p_drop, training=True, seed=123))
    assert out_tr.shape == (B, S, D)
    scaled = ref / (1.0 - p_drop)
    ok = jnp.isclose(out_tr, 0.0, atol=1e-6) | jnp.isclose(
        out_tr, scaled, atol=1e-5, rtol=1e-5)
    assert bool(jnp.all(ok)), "dropout output must be 0 or (x+pe)/(1-p)"

    print("KERNEL_OK")
</pallas_src>

<mosaic_0001>
module attributes {stable_mosaic.version = 11 : i64} {
  func.func @_pe_add_kernel(%arg0: i32, %arg1: i32, %arg2: memref<1x1x256xf32, #tpu.memory_space<vmem>>, %arg3: memref<1x256xf32, #tpu.memory_space<vmem>>, %arg4: memref<1x1x256xf32, #tpu.memory_space<vmem>>) attributes {dimension_semantics = [#tpu.dimension_semantics<parallel>, #tpu.dimension_semantics<parallel>], iteration_bounds = array<i64: 1, 2>, scalar_prefetch = 0 : i64, scratch_operands = 0 : i64, tpu.core_type = #tpu.core_type<tc>, window_params = [{transform_indices = @transform_0, window_bounds = array<i64: 1, 1, 256>}, {transform_indices = @transform_1, window_bounds = array<i64: 1, 256>}, {transform_indices = @transform_2, window_bounds = array<i64: 1, 1, 256>}]} {
    %c0 = arith.constant 0 : index
    %c0_0 = arith.constant 0 : index
    %c0_1 = arith.constant 0 : index
    %0 = vector.load %arg2[%c0, %c0_0, %c0_1] : memref<1x1x256xf32, #tpu.memory_space<vmem>>, vector<1x1x256xf32>
    %1 = vector.shape_cast %0 : vector<1x1x256xf32> to vector<1x256xf32>
    %c0_2 = arith.constant 0 : index
    %c0_3 = arith.constant 0 : index
    %2 = vector.load %arg3[%c0_2, %c0_3] : memref<1x256xf32, #tpu.memory_space<vmem>>, vector<1x256xf32>
    %3 = arith.addf %1, %2 : vector<1x256xf32>
    %c0_4 = arith.constant 0 : index
    %c0_5 = arith.constant 0 : index
    %c0_6 = arith.constant 0 : index
    %4 = vector.load %arg4[%c0_4, %c0_5, %c0_6] : memref<1x1x256xf32, #tpu.memory_space<vmem>>, vector<1x1x256xf32>
    %5 = vector.shape_cast %4 : vector<1x1x256xf32> to vector<1x256xf32>
    %6 = vector.shape_cast %3 : vector<1x256xf32> to vector<1x1x256xf32>
    tpu.vector_store %arg4[%c0_4, %c0_5, %c0_6], %6 {strides = array<i32>} : memref<1x1x256xf32, #tpu.memory_space<vmem>>, vector<1x1x256xf32>,
    return
  }
  func.func @transform_0(%arg0: i32, %arg1: i32) -> (i32, i32, i32) {
    %c0_i32 = arith.constant 0 : i32
    %c0_i32_0 = arith.constant 0 : i32
    return %arg1, %arg0, %c0_i32 : i32, i32, i32
  }
  func.func @transform_1(%arg0: i32, %arg1: i32) -> (i32, i32) {
    %c0_i32 = arith.constant 0 : i32
    %c0_i32_0 = arith.constant 0 : i32
    return %arg0, %c0_i32 : i32, i32
  }
  func.func @transform_2(%arg0: i32, %arg1: i32) -> (i32, i32, i32) {
    %c0_i32 = arith.constant 0 : i32
    %c0_i32_0 = arith.constant 0 : i32
    return %arg1, %arg0, %c0_i32 : i32, i32, i32
  }
}

</mosaic_0001>

<bundles_post_ra>
// kernel: tpu_custom_call.1
= control target key start
LH: loop header
LB: loop body
LE: loop exit
PB: predicated region body
PF: predicated region fallthrough
CT: control target
= control target key end

     0   :  { %7 = vsyncpa [#allocation3], 0  ;;  %s731_s0 = inlined_call_operand.hbm [shape: f32[2,1,256], index: 0, kind: input, shape index: {}]   ;;  %s732_s1 = inlined_call_operand.hbm [shape: f32[1,256], index: 1, kind: input, shape index: {}]   ;;  %s733_s2 = inlined_call_operand.hbm [shape: f32[2,1,256], index: 2, kind: output, shape index: {}]  }
   0x1   :  { %9 = vsyncpa [#allocation3 + $0x1], 0 }
   0x2   :  { %10 = vsyncpa [#allocation6], 0 }
   0x3   :  { %11 = vsyncpa [#allocation4], 0 }
   0x4   :  { %13 = vsyncpa [#allocation4 + $0x1], 0  ;;  %s570_s9 = smov 0   ;;  %s572_s10 = smov 0  }
   0x5   :  { %s574_s11 = smov 0   ;;  %s576_s12 = smov 0  }
   0x6   :  { %s578_s13 = smov 0   ;;  %s580_s14 = smov 0  }
   0x7 LB: > { %s320_s15 = sadd.s32 4294967295, %s550_s14   ;;  %s321_s16 = sadd.s32 4294967294, %s550_s14   ;;  %s550_s14 = sphi %s580_s14, %s19_s14   ;;  %s546_s13 = sphi %s578_s13, %s750_s13   ;;  %s542_s12 = sphi %s576_s12, %s749_s12   ;;  %s538_s11 = sphi %s574_s11, %s748_s11   ;;  %s534_s10 = sphi %s572_s10, %s747_s10   ;;  %s530_s9 = sphi %s570_s9, %s746_s9  }
   0x8   : > { %p53_p0 = scmp.ne.s32.totalorder %s534_s10, %s530_s9  ;;  %p604_p1 = scmp.eq.s32.totalorder %s320_s15, 0 }
   0x9   : > { %p608_p2 = scmp.eq.s32.totalorder %s320_s15, 1  ;;  %p111_p3 = scmp.eq.s32.totalorder %s321_s16, 1 }
   0xa   : > { %p614_p4 = por %p604_p1, %p53_p0  ;;  %p322_p5 = scmp.ge.s32.totalorder %s550_s14, 1 }
   0xb   : > { %p619_p6 = por %p111_p3, %p53_p0  ;;  %p118_p7 = scmp.lt.s32.totalorder %s550_s14, 3 }
   0xc   : > { %s737_s19 = scalar_select %p614_p4, 1, 0 }
   0xd   : > { %s738_s20 = scalar_select %p619_p6, 1, 0 }
   0xe   : > { %p624_p8 = pnand %p322_p5, %p118_p7  ;;  %s552_s22 = smov [#allocation5]  }
   0xf   : > { %s134_s23 = sshll.u32 %s552_s22, 4  ;;  %s28_s25 = sadd.s32 1, %s546_s13  ;;  %s135_s23 = int_to_ptr.vmem [resolvable:$true] %s134_s23 }
  0x10   : > { %p347_p10 = pneg %p624_p8  ;;  %s40_s26 = sadd.s32 1, %s538_s11 }
  0x11   : > { %p29_p12 = scmp.ge.s32.totalorder %s28_s25, 2  ;;  %s423_s27 = scalar_lea.vmem %s135_s23, 32 }
  0x12   : > { %p633_p11 = pnand %p347_p10, %p604_p1  ;;  %p424_p0 = scmp.ne.s32.totalorder %s135_s23, %s423_s27 }
  0x13   : > { %p431_p7 = scmp.lt.s32.totalorder %s135_s23, %s135_s23  ;;  %p432_p6 = scmp.lt.s32.totalorder %s423_s27, %s423_s27 }
  0x14   : > { %p414_p13 = pneg %p633_p11 }
  0x15   : > { %p433_p9 = por %p432_p6, %p431_p7 }
  0x16   : > { %p426_p3 = pnand %p424_p0, %p414_p13 }
  0x18   : > { %p427_p5 = pneg %p426_p3 }
  0x1a   : > { %p434_p4 = pnand %p433_p9, %p427_p5 }
  0x1c   : > { %437 = shalt.err (!%p434_p4)
}
  0x1d   : > { %350 = dma.hbm_to_vmem [thread:$0]  (!%p633_p11), %s732_s1, 32, %s135_s23, [#allocation6]  }
  0x1e   : > { %s752_s25 = smov (%p29_p12, %s28_s25), 0  ;;  %p47_p6 = scmp.ne.s32.totalorder %s538_s11, %s534_s10 }
  0x1f   : > { %p48_p4 = scmp.eq.s32.totalorder %s550_s14, 0  ;;  %s35_s30 = ssub.s32 %s546_s13, %s752_s25 }
  0x20   : > { %p360_p9 = scmp.lt.s32.totalorder %s550_s14, 2  ;;  %p38_p10 = scmp.eq.s32.totalorder %s35_s30, 0 }
  0x21   : > { %p49_p13 = por %p48_p4, %p47_p6  ;;  %p656_p0 = por %p608_p2, %p47_p6 }
  0x22   : > { %s145_s4 = sand.u32 1, %s538_s11   ;;  %s337_s7 = sshll.u32 %s546_s13, 5 }
  0x23   : > { %s662_s5 = scalar_select %p38_p10, %s538_s11, %s40_s26  }
  0x24   : > { %s325_s6 = sshll.u32 %s145_s4, 1  ;;  %s157_s16 = scalar_lea.hbm %s731_s0, %s337_s7 }
  0x25   : > { %s149_s22 = scalar_lea.vmem [#allocation2], %s325_s6  ;;  %p668_p11 = pnand %p360_p9, %p49_p13 }
  0x26   : > { %s159_s23 = sshll.u32 %s149_s22, 4  ;;  %s146_s18 = scalar_lea.sflag [#allocation3], %s145_s4  ;;  %s160_s23 = int_to_ptr.vmem [resolvable:$true] %s159_s23 }
  0x27   : > { %p440_p2 = pneg %p668_p11  ;;  %s451_s27 = scalar_lea.vmem %s160_s23, 32 }
  0x28   : > { %p452_p12 = scmp.ne.s32.totalorder %s160_s23, %s451_s27  ;;  %s553_s26 = smov [#allocation2]  }
  0x29   : > { %s456_s28 = sshll.u32 %s553_s26, 4  ;;  %s457_s28 = int_to_ptr.vmem [resolvable:$false] %s456_s28 }
  0x2a   : > { %p454_p3 = pnand %p452_p12, %p440_p2  ;;  %s458_s29 = scalar_lea.vmem %s457_s28, 64 }
  0x2b   : > { %p459_p7 = scmp.lt.s32.totalorder %s160_s23, %s457_s28  ;;  %p460_p6 = scmp.lt.s32.totalorder %s458_s29, %s451_s27 }
  0x2c   : > { %p455_p5 = pneg %p454_p3 }
  0x2d   : > { %p461_p4 = por %p460_p6, %p459_p7 }
  0x2f   : > { %p462_p10 = pnand %p461_p4, %p455_p5 }
  0x31   : > { %465 = shalt.err (!%p462_p10)
}
  0x32   : > { %354 = dma.hbm_to_vmem [thread:$0]  (!%p668_p11), %s157_s16, 32, %s160_s23, %s146_s18  }
  0x33   : > { %168 = sbr.rel (%p624_p8) target bundleno = 83 (0x53), region = 28  ;;  %s679_s30 = sand.u32 (!%p624_p8), 1, %s534_s10  }
  0x34   : > { %s329_s4 = sshll.u32 (!%p624_p8), %s679_s30, 1  ;;  %s171_s6 = scalar_lea.sflag (!%p624_p8), [#allocation3], %s679_s30 }
  0x35   : > { %s174_s7 = scalar_lea.vmem (!%p624_p8), [#allocation2], %s329_s4  ;;  %p743_p9 = scmp.ne.s32.totalorder (!%p624_p8), %s737_s19, 0 }
  0x38   : > { %517 = dma.done.wait (%p743_p9), %s171_s6, 32  }
  0x39   : > { %519 = vsyncadd (%p743_p9), %s171_s6, 4294967264 }
  0x3a   : > { %521 = dma.done.wait (%p604_p1), [#allocation6], 32  }
  0x3b   : > { %523 = vsyncadd (%p604_p1), [#allocation6], 4294967264  ;;  %v202_v0 = vlaneseq  ;;  %s198_s21 = scalar_lea.vmem [#allocation7], %s329_s4  ;;  %s338_s15 = sshll.u32 %s542_s12, 5  ;;  %v199_v1 = vld [vmem:[%s174_s7] sm:$0x3] }
  0x3c   : > { %s224_s8 = sshll.u32 %s198_s21, 4  ;;  %v200_v2 = vld [vmem:[#allocation5] sm:$0x3]  ;;  %s222_s22 = scalar_lea.hbm %s733_s2, %s338_s15  ;;  %s225_s8 = int_to_ptr.vmem [resolvable:$true] %s224_s8 }
  0x3d   : > { %vm204_vm0 = vcmp.lt.s32.totalorder %v202_v0, 256  ;;  %v201_v3 = vadd.f32 %v200_v2, %v199_v1  ;;  %s208_s23 = scalar_lea.sflag [#allocation4], %s679_s30  ;;  %s466_s17 = scalar_lea.vmem %s225_s8, 32 }
  0x3e   : > { %p467_p1 = scmp.ne.s32.totalorder %s225_s8, %s466_s17  ;;  %s554_s24 = smov [#allocation7]  }
  0x3f   : > { %206 = vst.msk [vmem:[%s198_s21] sm:$0x3] %vm204_vm0, %v201_v3  ;;  %s470_s18 = sshll.u32 %s554_s24, 4  ;;  %s471_s18 = int_to_ptr.vmem [resolvable:$false] %s470_s18 }
  0x40   : > { %p468_p8 = pnand %p467_p1, %p656_p0  ;;  %s472_s12 = scalar_lea.vmem %s471_s18, 64 }
  0x41   : > { %p473_p11 = scmp.lt.s32.totalorder %s225_s8, %s471_s18  ;;  %p474_p2 = scmp.lt.s32.totalorder %s472_s12, %s466_s17 }
  0x42   : > { %p469_p13 = pneg %p468_p8 }
  0x43   : > { %p475_p12 = por %p474_p2, %p473_p11 }
  0x45   : > { %p476_p3 = pnand %p475_p12, %p469_p13 }
  0x47   : > { %479 = shalt.err (!%p476_p3)
}
  0x48   : > { %s480_s27 = scalar_lea.hbm %s222_s22, 32  ;;  %s484_s29 = scalar_lea.hbm %s733_s2, 64 }
  0x49   : > { %p481_p5 = scmp.ne.s32.totalorder %s222_s22, %s480_s27  ;;  %p485_p4 = scmp.lt.s32.totalorder %s222_s22, %s733_s2 }
  0x4a   : > { %p486_p10 = scmp.lt.s32.totalorder %s484_s29, %s480_s27 }
  0x4b   : > { %p482_p7 = pnand %p481_p5, %p656_p0 }
  0x4c   : > { %p487_p9 = por %p486_p10, %p485_p4 }
  0x4d   : > { %p483_p6 = pneg %p482_p7 }
  0x4f   : > { %p488_p1 = pnand %p487_p9, %p483_p6 }
  0x51   : > { %491 = shalt.err (!%p488_p1)
}
  0x52   : > { %345 = dma.vmem_to_hbm [thread:$0]  (%p656_p0), %s225_s8, 32, %s222_s22, %s208_s23  }
  0x53 PF: > { %s236_s6 = sand.u32 1, %s530_s9   ;;  %p744_p8 = scmp.ne.s32.totalorder %s738_s20, 0 }
  0x54   : > { %p745_p13 = scmp.ge.s32.totalorder %s550_s14, 2  ;;  %s237_s7 = scalar_lea.sflag [#allocation4], %s236_s6 }
  0x56   : > { %p356_p11 = pnand %p745_p13, %p744_p8 }
  0x58   : > { %p357_p2 = pneg %p356_p11 }
  0x5a   : > { %525 = dma.done.wait (%p357_p2), %s237_s7, 32  }
  0x5b   : > { %527 = vsyncadd (%p357_p2), %s237_s7, 4294967264  ;;  %s19_s14 = sadd.s32 1, %s550_s14   ;;  %s746_s9 = smov %s534_s10 }
  0x5c   : > { %p16_p12 = scmp.ge.s32.totalorder %s19_s14, 4   ;;  %s747_s10 = smov %s538_s11 }
  0x5d   : > { %s748_s11 = smov %s662_s5  ;;  %s749_s12 = smov %s546_s13 }
  0x5e   : > { %s750_s13 = smov %s752_s25  ;;  %18 = sbr.rel (!%p16_p12) target bundleno = 7 (0x7), region = 78 }
  0x63   :  { %242 = vsyncpa [#allocation3], 1 }
  0x64   :  { %244 = vsyncpa [#allocation3 + $0x1], 1 }
  0x65   :  { %245 = vsyncpa [#allocation6], 1 }
  0x66   :  { %246 = vsyncpa [#allocation4], 1 }
  0x67   :  { %248 = vsyncpa [#allocation4 + $0x1], 1 }

</bundles_post_ra>
